<compile_context>
chip_gen: v5e
topology: v5e:2x2
jax: 0.10.0
libtpu: 0.0.40
codegen_flags: <defaults>
</compile_context>

<pallas_src>
import functools

import jax
import jax.numpy as jnp
from jax.experimental import pallas as pl
from jax.experimental.pallas import tpu as pltpu

D_IN, H1, H2, H3, D_OUT = 212, 500, 250, 125, 4
# Lane-aligned (multiple-of-128) padded dims used inside the kernel.
P_IN, P1, P2, P3, P_OUT = 256, 512, 256, 128, 128

WEIGHT_ELEMS = P_IN * P1 + P1 * P2 + P2 * P3 + P3 * P_OUT  # padded weight count


def _round_up(n, m):
    return ((n + m - 1) // m) * m


def _cdiv(a, b):
    return -(-a // b)


def _mlp_kernel(x_ref,
                w1_ref, b1_ref,
                w2_ref, b2_ref,
                w3_ref, b3_ref,
                w4_ref, b4_ref,
                o_ref):
    """One batch tile: 4 fused MXU matmuls (bf16 operands, f32 acc) + VPU bias/ReLU."""
    bf16 = jnp.bfloat16
    f32 = jnp.float32
    # x arrives already in bf16 (cast + padded in the wrapper).
    h = jnp.dot(x_ref[...], w1_ref[...], preferred_element_type=f32) + b1_ref[...]
    h = jnp.maximum(h, 0.0)
    h = jnp.dot(h.astype(bf16), w2_ref[...], preferred_element_type=f32) + b2_ref[...]
    h = jnp.maximum(h, 0.0)
    h = jnp.dot(h.astype(bf16), w3_ref[...], preferred_element_type=f32) + b3_ref[...]
    h = jnp.maximum(h, 0.0)
    out = jnp.dot(h.astype(bf16), w4_ref[...], preferred_element_type=f32) + b4_ref[...]
    o_ref[...] = out.astype(o_ref.dtype)


def _pad_params(params):
    """Zero-pad weights/biases to lane-aligned shapes; weights -> bf16, biases -> f32."""
    def padw(w, pin, pout):
        fin, fout = w.shape
        w = jnp.pad(w, ((0, pin - fin), (0, pout - fout)))
        return w.astype(jnp.bfloat16)

    def padb(b, pout):
        b = jnp.asarray(b).reshape(1, -1)          # accept (out,) or (1, out)
        return jnp.pad(b, ((0, 0), (0, pout - b.shape[1]))).astype(jnp.float32)

    return (
        padw(params["w1"], P_IN, P1), padb(params["b1"], P1),
        padw(params["w2"], P1, P2), padb(params["b2"], P2),
        padw(params["w3"], P2, P3), padb(params["b3"], P3),
        padw(params["w4"], P3, P_OUT), padb(params["b4"], P_OUT),
    )


@functools.partial(jax.jit, static_argnames=("tb",))
def mlp_forward(x, params, *, tb=2048):
    """x: (B, 212) float32.  params: dict of w1..w4 (in,out) and b1..b4 (1,out)."""
    B = x.shape[0]

    # Adaptive batch tiling: at most ~15 rows of padding per tile, and an even
    # tile count for large batches so both v7x TensorCores get work.
    n_tiles = max(1, _cdiv(B, tb))
    if B >= 1024 and n_tiles % 2 == 1:
        n_tiles += 1
    TB = _round_up(_cdiv(B, n_tiles), 16)   # 16: bf16 sublane-packed tile granule
    Bp = n_tiles * TB

    # Pad input (batch -> Bp, features 212 -> 256) and cast to bf16 in the
    # wrapper: halves the dominant HBM stream and removes the in-kernel cast.
    x_p = jnp.pad(x.astype(jnp.bfloat16), ((0, Bp - B), (0, P_IN - D_IN)))

    (w1, b1, w2, b2, w3, b3, w4, b4) = _pad_params(params)

    resident = lambda shape: pl.BlockSpec(shape, lambda i: (0, 0))

    # VMEM budget (per tile, with double-buffering of x/out and the compiler's
    # f32 intermediates + bf16 re-casts), plus margin.
    per_row_bytes = (
        2 * P_IN * 2            # x tile, bf16, double-buffered
        + 2 * P_OUT * 2         # out tile, bf16, double-buffered
        + (P1 + P2 + P3) * 4    # f32 hidden activations
        + (P1 + P2 + P3) * 2    # bf16 copies fed to the next matmul
    )
    vmem_need = TB * per_row_bytes + 2 * WEIGHT_ELEMS * 2 + (2 << 20)
    vmem_limit = int(min(max(2 * vmem_need, 16 << 20), 96 << 20))

    flops = 2 * Bp * WEIGHT_ELEMS
    bytes_accessed = (
        x_p.size * 2                                        # bf16 input
        + (w1.size + w2.size + w3.size + w4.size) * 2       # bf16 weights
        + (b1.size + b2.size + b3.size + b4.size) * 4       # f32 biases
        + Bp * P_OUT * 2                                    # bf16 output
    )

    out_p = pl.pallas_call(
        _mlp_kernel,
        out_shape=jax.ShapeDtypeStruct((Bp, P_OUT), jnp.bfloat16),
        grid=(n_tiles,),
        in_specs=[
            pl.BlockSpec((TB, P_IN), lambda i: (i, 0)),   # x: tiled over batch
            resident((P_IN, P1)), resident((1, P1)),      # weights stay in VMEM
            resident((P1, P2)), resident((1, P2)),
            resident((P2, P3)), resident((1, P3)),
            resident((P3, P_OUT)), resident((1, P_OUT)),
        ],
        out_specs=pl.BlockSpec((TB, P_OUT), lambda i: (i, 0)),
        compiler_params=pltpu.CompilerParams(
            dimension_semantics=("parallel",),   # v7x: batch tiles shard over 2 TCs
            vmem_limit_bytes=vmem_limit,
        ),
        cost_estimate=pl.CostEstimate(
            flops=flops, transcendentals=0, bytes_accessed=bytes_accessed),
    )(x_p, w1, b1, w2, b2, w3, b3, w4, b4)

    # Drop batch/lane padding and return f32 like the PyTorch module.
    return out_p[:B, :D_OUT].astype(jnp.float32)


def init_params(key):
    """Deterministic init mimicking nn.Linear default (uniform +/- 1/sqrt(fan_in))."""
    dims = [(D_IN, H1), (H1, H2), (H2, H3), (H3, D_OUT)]
    params = {}
    for i, (fin, fout) in enumerate(dims, start=1):
        key, kw, kb = jax.random.split(key, 3)
        bound = 1.0 / jnp.sqrt(float(fin))
        params[f"w{i}"] = jax.random.uniform(
            kw, (fin, fout), jnp.float32, minval=-bound, maxval=bound)
        params[f"b{i}"] = jax.random.uniform(
            kb, (1, fout), jnp.float32, minval=-bound, maxval=bound)
    return params


def mlp_reference_bf16(x, p):
    """Reference with matching bf16-operand / f32-accumulate / bf16-output numerics."""
    bf16 = jnp.bfloat16
    f32 = jnp.float32
    h = jnp.maximum(jnp.dot(x.astype(bf16), p["w1"].astype(bf16),
                            preferred_element_type=f32) + p["b1"], 0.0)
    h = jnp.maximum(jnp.dot(h.astype(bf16), p["w2"].astype(bf16),
                            preferred_element_type=f32) + p["b2"], 0.0)
    h = jnp.maximum(jnp.dot(h.astype(bf16), p["w3"].astype(bf16),
                            preferred_element_type=f32) + p["b3"], 0.0)
    out = jnp.dot(h.astype(bf16), p["w4"].astype(bf16),
                  preferred_element_type=f32) + p["b4"]
    return out.astype(bf16).astype(f32)   # match the kernel's bf16 output store


def mlp_reference_f32(x, p):
    h = jnp.maximum(x @ p["w1"] + p["b1"], 0.0)
    h = jnp.maximum(h @ p["w2"] + p["b2"], 0.0)
    h = jnp.maximum(h @ p["w3"] + p["b3"], 0.0)
    return h @ p["w4"] + p["b4"]


if __name__ == "__main__":
    key = jax.random.PRNGKey(0)
    key, kx = jax.random.split(key)
    B = 2
    x = jax.random.normal(kx, (B, D_IN), jnp.float32)
    params = init_params(key)

    out = mlp_forward(x, params)
    out = jax.block_until_ready(out)
    assert out.shape == (B, D_OUT), out.shape

    ref_bf16 = mlp_reference_bf16(x, params)
    assert jnp.allclose(out, ref_bf16, atol=1e-2, rtol=1e-2), \
        "mismatch vs bf16-matched reference"

    ref_f32 = mlp_reference_f32(x, params)
    assert jnp.allclose(out, ref_f32, atol=1e-1, rtol=1e-1), \
        "mismatch vs f32 reference"

    print("KERNEL_OK")
</pallas_src>

<mosaic_0001>
module attributes {stable_mosaic.version = 11 : i64} {
  func.func @_mlp_kernel(%arg0: i32, %arg1: memref<16x256xbf16, #tpu.memory_space<vmem>>, %arg2: memref<256x512xbf16, #tpu.memory_space<vmem>>, %arg3: memref<1x512xf32, #tpu.memory_space<vmem>>, %arg4: memref<512x256xbf16, #tpu.memory_space<vmem>>, %arg5: memref<1x256xf32, #tpu.memory_space<vmem>>, %arg6: memref<256x128xbf16, #tpu.memory_space<vmem>>, %arg7: memref<1x128xf32, #tpu.memory_space<vmem>>, %arg8: memref<128x128xbf16, #tpu.memory_space<vmem>>, %arg9: memref<1x128xf32, #tpu.memory_space<vmem>>, %arg10: memref<16x128xbf16, #tpu.memory_space<vmem>>) attributes {dimension_semantics = [#tpu.dimension_semantics<parallel>], iteration_bounds = array<i64: 1>, scalar_prefetch = 0 : i64, scratch_operands = 0 : i64, tpu.core_type = #tpu.core_type<tc>, window_params = [{transform_indices = @transform_0, window_bounds = array<i64: 16, 256>}, {pipeline_mode = #tpu.pipeline_mode<synchronous>, transform_indices = @transform_1, window_bounds = array<i64: 256, 512>}, {pipeline_mode = #tpu.pipeline_mode<synchronous>, transform_indices = @transform_2, window_bounds = array<i64: 1, 512>}, {pipeline_mode = #tpu.pipeline_mode<synchronous>, transform_indices = @transform_3, window_bounds = array<i64: 512, 256>}, {pipeline_mode = #tpu.pipeline_mode<synchronous>, transform_indices = @transform_4, window_bounds = array<i64: 1, 256>}, {pipeline_mode = #tpu.pipeline_mode<synchronous>, transform_indices = @transform_5, window_bounds = array<i64: 256, 128>}, {pipeline_mode = #tpu.pipeline_mode<synchronous>, transform_indices = @transform_6, window_bounds = array<i64: 1, 128>}, {pipeline_mode = #tpu.pipeline_mode<synchronous>, transform_indices = @transform_7, window_bounds = array<i64: 128, 128>}, {pipeline_mode = #tpu.pipeline_mode<synchronous>, transform_indices = @transform_8, window_bounds = array<i64: 1, 128>}, {transform_indices = @transform_9, window_bounds = array<i64: 16, 128>}]} {
    %c0 = arith.constant 0 : index
    %c0_0 = arith.constant 0 : index
    %0 = vector.load %arg1[%c0, %c0_0] : memref<16x256xbf16, #tpu.memory_space<vmem>>, vector<16x256xbf16>
    %c0_1 = arith.constant 0 : index
    %c0_2 = arith.constant 0 : index
    %1 = vector.load %arg2[%c0_1, %c0_2] : memref<256x512xbf16, #tpu.memory_space<vmem>>, vector<256x512xbf16>
    %cst = arith.constant dense<0.000000e+00> : vector<16x512xf32>
    %2 = tpu.matmul %0, %1, %cst {dimension_numbers = #tpu.dot_dimension_numbers<[1], [0], [0], [1], [0, 0, 1, 1], [], []>} : vector<16x256xbf16>, vector<256x512xbf16>, vector<16x512xf32> -> vector<16x512xf32>
    %c0_3 = arith.constant 0 : index
    %c0_4 = arith.constant 0 : index
    %3 = vector.load %arg3[%c0_3, %c0_4] : memref<1x512xf32, #tpu.memory_space<vmem>>, vector<1x512xf32>
    %4 = vector.broadcast %3 : vector<1x512xf32> to vector<16x512xf32>
    %5 = arith.addf %2, %4 : vector<16x512xf32>
    %cst_5 = arith.constant 0.000000e+00 : f32
    %6 = vector.broadcast %cst_5 : f32 to vector<16x512xf32>
    %7 = arith.maximumf %5, %6 : vector<16x512xf32>
    %8 = arith.truncf %7 : vector<16x512xf32> to vector<16x512xbf16>
    %c0_6 = arith.constant 0 : index
    %c0_7 = arith.constant 0 : index
    %9 = vector.load %arg4[%c0_6, %c0_7] : memref<512x256xbf16, #tpu.memory_space<vmem>>, vector<512x256xbf16>
    %cst_8 = arith.constant dense<0.000000e+00> : vector<16x256xf32>
    %10 = tpu.matmul %8, %9, %cst_8 {dimension_numbers = #tpu.dot_dimension_numbers<[1], [0], [0], [1], [0, 0, 1, 1], [], []>} : vector<16x512xbf16>, vector<512x256xbf16>, vector<16x256xf32> -> vector<16x256xf32>
    %c0_9 = arith.constant 0 : index
    %c0_10 = arith.constant 0 : index
    %11 = vector.load %arg5[%c0_9, %c0_10] : memref<1x256xf32, #tpu.memory_space<vmem>>, vector<1x256xf32>
    %12 = vector.broadcast %11 : vector<1x256xf32> to vector<16x256xf32>
    %13 = arith.addf %10, %12 : vector<16x256xf32>
    %cst_11 = arith.constant 0.000000e+00 : f32
    %14 = vector.broadcast %cst_11 : f32 to vector<16x256xf32>
    %15 = arith.maximumf %13, %14 : vector<16x256xf32>
    %16 = arith.truncf %15 : vector<16x256xf32> to vector<16x256xbf16>
    %c0_12 = arith.constant 0 : index
    %c0_13 = arith.constant 0 : index
    %17 = vector.load %arg6[%c0_12, %c0_13] : memref<256x128xbf16, #tpu.memory_space<vmem>>, vector<256x128xbf16>
    %cst_14 = arith.constant dense<0.000000e+00> : vector<16x128xf32>
    %18 = tpu.matmul %16, %17, %cst_14 {dimension_numbers = #tpu.dot_dimension_numbers<[1], [0], [0], [1], [0, 0, 1, 1], [], []>} : vector<16x256xbf16>, vector<256x128xbf16>, vector<16x128xf32> -> vector<16x128xf32>
    %c0_15 = arith.constant 0 : index
    %c0_16 = arith.constant 0 : index
    %19 = vector.load %arg7[%c0_15, %c0_16] : memref<1x128xf32, #tpu.memory_space<vmem>>, vector<1x128xf32>
    %20 = vector.broadcast %19 : vector<1x128xf32> to vector<16x128xf32>
    %21 = arith.addf %18, %20 : vector<16x128xf32>
    %cst_17 = arith.constant 0.000000e+00 : f32
    %22 = vector.broadcast %cst_17 : f32 to vector<16x128xf32>
    %23 = arith.maximumf %21, %22 : vector<16x128xf32>
    %24 = arith.truncf %23 : vector<16x128xf32> to vector<16x128xbf16>
    %c0_18 = arith.constant 0 : index
    %c0_19 = arith.constant 0 : index
    %25 = vector.load %arg8[%c0_18, %c0_19] : memref<128x128xbf16, #tpu.memory_space<vmem>>, vector<128x128xbf16>
    %cst_20 = arith.constant dense<0.000000e+00> : vector<16x128xf32>
    %26 = tpu.matmul %24, %25, %cst_20 {dimension_numbers = #tpu.dot_dimension_numbers<[1], [0], [0], [1], [0, 0, 1, 1], [], []>} : vector<16x128xbf16>, vector<128x128xbf16>, vector<16x128xf32> -> vector<16x128xf32>
    %c0_21 = arith.constant 0 : index
    %c0_22 = arith.constant 0 : index
    %27 = vector.load %arg9[%c0_21, %c0_22] : memref<1x128xf32, #tpu.memory_space<vmem>>, vector<1x128xf32>
    %28 = vector.broadcast %27 : vector<1x128xf32> to vector<16x128xf32>
    %29 = arith.addf %26, %28 : vector<16x128xf32>
    %30 = arith.truncf %29 : vector<16x128xf32> to vector<16x128xbf16>
    %c0_23 = arith.constant 0 : index
    %c0_24 = arith.constant 0 : index
    %31 = vector.load %arg10[%c0_23, %c0_24] : memref<16x128xbf16, #tpu.memory_space<vmem>>, vector<16x128xbf16>
    tpu.vector_store %arg10[%c0_23, %c0_24], %30 {strides = array<i32>} : memref<16x128xbf16, #tpu.memory_space<vmem>>, vector<16x128xbf16>,
    return
  }
  func.func @transform_0(%arg0: i32) -> (i32, i32) {
    %c0_i32 = arith.constant 0 : i32
    %c0_i32_0 = arith.constant 0 : i32
    return %arg0, %c0_i32 : i32, i32
  }
  func.func @transform_1(%arg0: i32) -> (i32, i32) {
    %c0_i32 = arith.constant 0 : i32
    %c0_i32_0 = arith.constant 0 : i32
    %c0_i32_1 = arith.constant 0 : i32
    return %c0_i32, %c0_i32_0 : i32, i32
  }
  func.func @transform_2(%arg0: i32) -> (i32, i32) {
    %c0_i32 = arith.constant 0 : i32
    %c0_i32_0 = arith.constant 0 : i32
    %c0_i32_1 = arith.constant 0 : i32
    return %c0_i32, %c0_i32_0 : i32, i32
  }
  func.func @transform_3(%arg0: i32) -> (i32, i32) {
    %c0_i32 = arith.constant 0 : i32
    %c0_i32_0 = arith.constant 0 : i32
    %c0_i32_1 = arith.constant 0 : i32
    return %c0_i32, %c0_i32_0 : i32, i32
  }
  func.func @transform_4(%arg0: i32) -> (i32, i32) {
    %c0_i32 = arith.constant 0 : i32
    %c0_i32_0 = arith.constant 0 : i32
    %c0_i32_1 = arith.constant 0 : i32
    return %c0_i32, %c0_i32_0 : i32, i32
  }
  func.func @transform_5(%arg0: i32) -> (i32, i32) {
    %c0_i32 = arith.constant 0 : i32
    %c0_i32_0 = arith.constant 0 : i32
    %c0_i32_1 = arith.constant 0 : i32
    return %c0_i32, %c0_i32_0 : i32, i32
  }
  func.func @transform_6(%arg0: i32) -> (i32, i32) {
    %c0_i32 = arith.constant 0 : i32
    %c0_i32_0 = arith.constant 0 : i32
    %c0_i32_1 = arith.constant 0 : i32
    return %c0_i32, %c0_i32_0 : i32, i32
  }
  func.func @transform_7(%arg0: i32) -> (i32, i32) {
    %c0_i32 = arith.constant 0 : i32
    %c0_i32_0 = arith.constant 0 : i32
    %c0_i32_1 = arith.constant 0 : i32
    return %c0_i32, %c0_i32_0 : i32, i32
  }
  func.func @transform_8(%arg0: i32) -> (i32, i32) {
    %c0_i32 = arith.constant 0 : i32
    %c0_i32_0 = arith.constant 0 : i32
    %c0_i32_1 = arith.constant 0 : i32
    return %c0_i32, %c0_i32_0 : i32, i32
  }
  func.func @transform_9(%arg0: i32) -> (i32, i32) {
    %c0_i32 = arith.constant 0 : i32
    %c0_i32_0 = arith.constant 0 : i32
    return %arg0, %c0_i32 : i32, i32
  }
}

</mosaic_0001>

<bundles_post_ra>
// kernel: mlp_forward.1
= control target key start
LH: loop header
LB: loop body
LE: loop exit
PB: predicated region body
PF: predicated region fallthrough
CT: control target
= control target key end

     0   :  { %s3035_s1 = inlined_call_operand.vmem [shape: bf16[256,512], index: 1, kind: input, shape index: {}]   ;;  %s3036_s0 = inlined_call_operand.vmem [shape: bf16[16,256], index: 0, kind: input, shape index: {}]   ;;  %s3037_s3 = inlined_call_operand.vmem [shape: bf16[512,256], index: 3, kind: input, shape index: {}]   ;;  %s3038_s2 = inlined_call_operand.vmem [shape: f32[1,512], index: 2, kind: input, shape index: {}]   ;;  %s3039_s6 = inlined_call_operand.vmem [shape: f32[1,128], index: 6, kind: input, shape index: {}]   ;;  %s3040_s5 = inlined_call_operand.vmem [shape: bf16[256,128], index: 5, kind: input, shape index: {}]   ;;  %s3041_s4 = inlined_call_operand.vmem [shape: f32[1,256], index: 4, kind: input, shape index: {}]   ;;  %s3042_s8 = inlined_call_operand.vmem [shape: f32[1,128], index: 8, kind: input, shape index: {}]   ;;  %s3043_s7 = inlined_call_operand.vmem [shape: bf16[128,128], index: 7, kind: input, shape index: {}]   ;;  %s3044_s9 = inlined_call_operand.vmem [shape: bf16[16,128], index: 9, kind: output, shape index: {}]  }
   0x1   :  { %v1445_v0 = vld [vmem:[%s3035_s1 + $0xe0] sm:$0xf]  ;;  %v1971_v1 = vld [vmem:[%s3035_s1 + $0xec] sm:$0xf0]  ;;  %v1969_v5 = vld [vmem:[%s3035_s1 + $0xe4] sm:$0xf] }
   0x2   :  { %v1573_v2 = vld [vmem:[%s3035_s1 + $0x1e0] sm:$0xf]  ;;  %v1446_v3 = vor.u32 %v1971_v1, %v1445_v0  ;;  %v2003_v4 = vld [vmem:[%s3035_s1 + $0x1ec] sm:$0xf0]  ;;  %v1447_v6 = vld [vmem:[%s3035_s1 + $0xf0] sm:$0xf0] }
   0x3   :  { %v1574_v7 = vor.u32 %v2003_v4, %v1573_v2  ;;  %v1450_v8 = vor.u32 %v1969_v5, %v1447_v6  ;;  %v2001_v9 = vld [vmem:[%s3035_s1 + $0x1e4] sm:$0xf]  ;;  %v1575_v10 = vld [vmem:[%s3035_s1 + $0x1f0] sm:$0xf0]  ;;  %v1429_v11 = vld [vmem:[%s3035_s1 + $0xc0] sm:$0xf] }
   0x4   :  { %438 = vmatpush.bf16.msra.mxu0 %v1446_v3  ;;  %v1578_v12 = vor.u32 %v2001_v9, %v1575_v10  ;;  %v1967_v13 = vld [vmem:[%s3035_s1 + $0xcc] sm:$0xf0]  ;;  %v1557_v14 = vld [vmem:[%s3035_s1 + $0x1c0] sm:$0xf]  ;;  %v1965_v18 = vld [vmem:[%s3035_s1 + $0xc4] sm:$0xf] }
   0x5   :  { %v1999_v15 = vld [vmem:[%s3035_s1 + $0x1cc] sm:$0xf0]  ;;  %452 = vmatpush.bf16.msra.mxu1 %v1574_v7  ;;  %466 = vmatpush.bf16.msra.mxu2 %v1450_v8  ;;  %v1430_v16 = vor.u32 %v1967_v13, %v1429_v11  ;;  %v1431_v19 = vld [vmem:[%s3035_s1 + $0xd0] sm:$0xf0]  ;;  %v1997_v20 = vld [vmem:[%s3035_s1 + $0x1c4] sm:$0xf] }
   0x6   :  { %v1558_v17 = vor.u32 %v1999_v15, %v1557_v14  ;;  %480 = vmatpush.bf16.msra.mxu3 %v1578_v12  ;;  %v1434_v21 = vor.u32 %v1965_v18, %v1431_v19  ;;  %v1559_v22 = vld [vmem:[%s3035_s1 + $0x1d0] sm:$0xf0]  ;;  %v1413_v23 = vld [vmem:[%s3035_s1 + $0xa0] sm:$0xf]  ;;  %v1963_v24 = vld [vmem:[%s3035_s1 + $0xac] sm:$0xf0] }
   0x7   :  { %v1562_v25 = vor.u32 %v1997_v20, %v1559_v22  ;;  %v1541_v26 = vld [vmem:[%s3035_s1 + $0x1a0] sm:$0xf]  ;;  %v1995_v27 = vld [vmem:[%s3035_s1 + $0x1ac] sm:$0xf0]  ;;  %v1961_v28 = vld [vmem:[%s3035_s1 + $0xa4] sm:$0xf]  ;;  %v1414_v29 = vor.u32 %v1963_v24, %v1413_v23 }
   0x8   :  { %439 = vmatpush.bf16.msra.mxu0 %v1430_v16  ;;  %v1415_v30 = vld [vmem:[%s3035_s1 + $0xb0] sm:$0xf0]  ;;  %v1993_v31 = vld [vmem:[%s3035_s1 + $0x1a4] sm:$0xf]  ;;  %v1542_v33 = vor.u32 %v1995_v27, %v1541_v26  ;;  %v1397_v35 = vld [vmem:[%s3035_s1 + $0x80] sm:$0xf] }
   0x9   :  { %v1543_v32 = vld [vmem:[%s3035_s1 + $0x1b0] sm:$0xf0]  ;;  %453 = vmatpush.bf16.msra.mxu1 %v1558_v17  ;;  %467 = vmatpush.bf16.msra.mxu2 %v1434_v21  ;;  %v1418_v34 = vor.u32 %v1961_v28, %v1415_v30  ;;  %v1959_v36 = vld [vmem:[%s3035_s1 + $0x8c] sm:$0xf0]  ;;  %v1525_v37 = vld [vmem:[%s3035_s1 + $0x180] sm:$0xf] }
   0xa   :  { %481 = vmatpush.bf16.msra.mxu3 %v1562_v25  ;;  %v1546_v38 = vor.u32 %v1993_v31, %v1543_v32  ;;  %v1991_v39 = vld [vmem:[%s3035_s1 + $0x18c] sm:$0xf0]  ;;  %v1957_v40 = vld [vmem:[%s3035_s1 + $0x84] sm:$0xf]  ;;  %v1399_v41 = vld [vmem:[%s3035_s1 + $0x90] sm:$0xf0]  ;;  %v1398_v44 = vor.u32 %v1959_v36, %v1397_v35 }
   0xb   :  { %v1989_v42 = vld [vmem:[%s3035_s1 + $0x184] sm:$0xf]  ;;  %v1527_v43 = vld [vmem:[%s3035_s1 + $0x190] sm:$0xf0]  ;;  %v1526_v45 = vor.u32 %v1991_v39, %v1525_v37  ;;  %v1402_v46 = vor.u32 %v1957_v40, %v1399_v41  ;;  %v1381_v47 = vld [vmem:[%s3035_s1 + $0x60] sm:$0xf] }
   0xc   :  { %440 = vmatpush.bf16.msra.mxu0 %v1414_v29  ;;  %v1955_v48 = vld [vmem:[%s3035_s1 + $0x6c] sm:$0xf0]  ;;  %v1509_v49 = vld [vmem:[%s3035_s1 + $0x160] sm:$0xf]  ;;  %v1530_v50 = vor.u32 %v1989_v42, %v1527_v43  ;;  %v1953_v52 = vld [vmem:[%s3035_s1 + $0x64] sm:$0xf] }
   0xd   :  { %454 = vmatpush.bf16.msra.mxu1 %v1542_v33  ;;  %468 = vmatpush.bf16.msra.mxu2 %v1418_v34  ;;  %v1987_v51 = vld [vmem:[%s3035_s1 + $0x16c] sm:$0xf0]  ;;  %v1383_v53 = vld [vmem:[%s3035_s1 + $0x70] sm:$0xf0]  ;;  %v1985_v54 = vld [vmem:[%s3035_s1 + $0x164] sm:$0xf]  ;;  %v1382_v56 = vor.u32 %v1955_v48, %v1381_v47 }
   0xe   :  { %482 = vmatpush.bf16.msra.mxu3 %v1546_v38  ;;  %v1511_v55 = vld [vmem:[%s3035_s1 + $0x170] sm:$0xf0]  ;;  %v1510_v57 = vor.u32 %v1987_v51, %v1509_v49  ;;  %v1386_v58 = vor.u32 %v1953_v52, %v1383_v53  ;;  %v1365_v59 = vld [vmem:[%s3035_s1 + $0x40] sm:$0xf]  ;;  %v1951_v60 = vld [vmem:[%s3035_s1 + $0x4c] sm:$0xf0] }
   0xf   :  { %v1493_v61 = vld [vmem:[%s3035_s1 + $0x140] sm:$0xf]  ;;  %v1514_v62 = vor.u32 %v1985_v54, %v1511_v55  ;;  %v1983_v63 = vld [vmem:[%s3035_s1 + $0x14c] sm:$0xf0]  ;;  %v1949_v0 = vld [vmem:[%s3035_s1 + $0x44] sm:$0xf]  ;;  %v1366_v4 = vor.u32 %v1951_v60, %v1365_v59 }
  0x10   :  { %441 = vmatpush.bf16.msra.mxu0 %v1398_v44  ;;  %v1367_v1 = vld [vmem:[%s3035_s1 + $0x50] sm:$0xf0]  ;;  %v1981_v2 = vld [vmem:[%s3035_s1 + $0x144] sm:$0xf]  ;;  %v1494_v5 = vor.u32 %v1983_v63, %v1493_v61  ;;  %v1349_v7 = vld [vmem:[%s3035_s1 + $0x20] sm:$0xf] }
  0x11   :  { %455 = vmatpush.bf16.msra.mxu1 %v1526_v45  ;;  %469 = vmatpush.bf16.msra.mxu2 %v1402_v46  ;;  %v1495_v3 = vld [vmem:[%s3035_s1 + $0x150] sm:$0xf0]  ;;  %v1370_v6 = vor.u32 %v1949_v0, %v1367_v1  ;;  %v1947_v8 = vld [vmem:[%s3035_s1 + $0x2c] sm:$0xf0]  ;;  %v1477_v9 = vld [vmem:[%s3035_s1 + $0x120] sm:$0xf] }
  0x12   :  { %483 = vmatpush.bf16.msra.mxu3 %v1530_v50  ;;  %v1498_v10 = vor.u32 %v1981_v2, %v1495_v3  ;;  %v1979_v11 = vld [vmem:[%s3035_s1 + $0x12c] sm:$0xf0]  ;;  %v1945_v12 = vld [vmem:[%s3035_s1 + $0x24] sm:$0xf]  ;;  %v1351_v13 = vld [vmem:[%s3035_s1 + $0x30] sm:$0xf0]  ;;  %v1350_v16 = vor.u32 %v1947_v8, %v1349_v7 }
  0x13   :  { %v1977_v14 = vld [vmem:[%s3035_s1 + $0x124] sm:$0xf]  ;;  %v1479_v15 = vld [vmem:[%s3035_s1 + $0x130] sm:$0xf0]  ;;  %v1333_v17 = vld [vmem:[%s3035_s1] sm:$0xf]  ;;  %v1478_v20 = vor.u32 %v1979_v11, %v1477_v9  ;;  %v1354_v21 = vor.u32 %v1945_v12, %v1351_v13 }
  0x14   :  { %442 = vmatpush.bf16.msra.mxu0 %v1382_v56  ;;  %v1943_v18 = vld [vmem:[%s3035_s1 + $0xc] sm:$0xf0]  ;;  %v1461_v19 = vld [vmem:[%s3035_s1 + $0x100] sm:$0xf]  ;;  %v1941_v23 = vld [vmem:[%s3035_s1 + $0x4] sm:$0xf]  ;;  %v1482_v25 = vor.u32 %v1977_v14, %v1479_v15 }
  0x15   :  { %456 = vmatpush.bf16.msra.mxu1 %v1510_v57  ;;  %470 = vmatpush.bf16.msra.mxu2 %v1386_v58  ;;  %v1975_v22 = vld [vmem:[%s3035_s1 + $0x10c] sm:$0xf0]  ;;  %v1335_v24 = vld [vmem:[%s3035_s1 + $0x10] sm:$0xf0]  ;;  %v1973_v26 = vld [vmem:[%s3035_s1 + $0x104] sm:$0xf]  ;;  %v1334_v32 = vor.u32 %v1943_v18, %v1333_v17 }
  0x16   :  { %484 = vmatpush.bf16.msra.mxu3 %v1514_v62  ;;  %v1463_v27 = vld [vmem:[%s3035_s1 + $0x110] sm:$0xf0]  ;;  %v1453_v28 = vld [vmem:[%s3035_s1 + $0xe8] sm:$0xf]  ;;  %v1972_v29 = vld [vmem:[%s3035_s1 + $0xf4] sm:$0xf0]  ;;  %v1462_v36 = vor.u32 %v1975_v22, %v1461_v19  ;;  %v1338_v37 = vor.u32 %v1941_v23, %v1335_v24 }
  0x17   :  { %v1581_v30 = vld [vmem:[%s3035_s1 + $0x1e8] sm:$0xf]  ;;  %v2004_v31 = vld [vmem:[%s3035_s1 + $0x1f4] sm:$0xf0]  ;;  %v1970_v33 = vld [vmem:[%s3035_s1 + $0xec] sm:$0xf]  ;;  %v1466_v41 = vor.u32 %v1973_v26, %v1463_v27  ;;  %v1454_v42 = vor.u32 %v1972_v29, %v1453_v28 }
  0x18   :  { %443 = vmatpush.bf16.msra.mxu0 %v1366_v4  ;;  %v1455_v34 = vld [vmem:[%s3035_s1 + $0xf8] sm:$0xf0]  ;;  %v2002_v35 = vld [vmem:[%s3035_s1 + $0x1ec] sm:$0xf]  ;;  %v1325_v39 = vld [vmem:[%s3036_s0] sm:$0xf]  ;;  %v1582_v45 = vor.u32 %v2004_v31, %v1581_v30 }
  0x19   :  { %457 = vmatpush.bf16.msra.mxu1 %v1494_v5  ;;  %471 = vmatpush.bf16.msra.mxu2 %v1370_v6  ;;  %v1583_v38 = vld [vmem:[%s3035_s1 + $0x1f8] sm:$0xf0]  ;;  %v1940_v40 = vld [vmem:[%s3036_s0 + $0x4] sm:$0xf0]  ;;  %v1939_v43 = vld [vmem:[%s3036_s0 + $0x4] sm:$0xf]  ;;  %v1458_v46 = vor.u32 %v1970_v33, %v1455_v34 }
  0x1a   :  { %485 = vmatpush.bf16.msra.mxu3 %v1498_v10  ;;  %v1327_v44 = vld [vmem:[%s3036_s0 + $0x8] sm:$0xf0]  ;;  %v1437_v47 = vld [vmem:[%s3035_s1 + $0xc8] sm:$0xf]  ;;  %v1968_v48 = vld [vmem:[%s3035_s1 + $0xd4] sm:$0xf0]  ;;  %v1586_v50 = vor.u32 %v2002_v35, %v1583_v38  ;;  %v2387_v51 = vor.u32 %v1940_v40, %v1325_v39 }
  0x1b   :  { %v1565_v49 = vld [vmem:[%s3035_s1 + $0x1c8] sm:$0xf]  ;;  %v2000_v52 = vld [vmem:[%s3035_s1 + $0x1d4] sm:$0xf0]  ;;  %v1966_v53 = vld [vmem:[%s3035_s1 + $0xcc] sm:$0xf]  ;;  %v2398_v55 = vor.u32 %v1939_v43, %v1327_v44  ;;  %v1438_v58 = vor.u32 %v1968_v48, %v1437_v47 }
  0x1c   :  { %444 = vmatpush.bf16.msra.mxu0 %v1350_v16  ;;  %v1439_v54 = vld [vmem:[%s3035_s1 + $0xd8] sm:$0xf0]  ;;  %v1998_v56 = vld [vmem:[%s3035_s1 + $0x1cc] sm:$0xf]  ;;  %v1566_v59 = vor.u32 %v2000_v52, %v1565_v49  ;;  %v1421_v61 = vld [vmem:[%s3035_s1 + $0xa8] sm:$0xf] }
  0x1d   :  { %458 = vmatpush.bf16.msra.mxu1 %v1478_v20  ;;  %472 = vmatpush.bf16.msra.mxu2 %v1354_v21  ;;  %v1567_v57 = vld [vmem:[%s3035_s1 + $0x1d8] sm:$0xf0]  ;;  %v1442_v60 = vor.u32 %v1966_v53, %v1439_v54  ;;  %v1964_v62 = vld [vmem:[%s3035_s1 + $0xb4] sm:$0xf0]  ;;  %v1549_v63 = vld [vmem:[%s3035_s1 + $0x1a8] sm:$0xf] }
  0x1e   :  { %486 = vmatpush.bf16.msra.mxu3 %v1482_v25  ;;  %v1570_v0 = vor.u32 %v1998_v56, %v1567_v57  ;;  %v1996_v1 = vld [vmem:[%s3035_s1 + $0x1b4] sm:$0xf0]  ;;  %v1962_v2 = vld [vmem:[%s3035_s1 + $0xac] sm:$0xf]  ;;  %v1423_v3 = vld [vmem:[%s3035_s1 + $0xb8] sm:$0xf0]  ;;  %v1422_v6 = vor.u32 %v1964_v62, %v1421_v61 }
  0x1f   :  { %v1994_v4 = vld [vmem:[%s3035_s1 + $0x1ac] sm:$0xf]  ;;  %v1551_v5 = vld [vmem:[%s3035_s1 + $0x1b8] sm:$0xf0]  ;;  %v1550_v7 = vor.u32 %v1996_v1, %v1549_v63  ;;  %v1426_v8 = vor.u32 %v1962_v2, %v1423_v3  ;;  %v1405_v9 = vld [vmem:[%s3035_s1 + $0x88] sm:$0xf] }
  0x20   :  { %445 = vmatpush.bf16.msra.mxu0 %v1334_v32  ;;  %v1960_v10 = vld [vmem:[%s3035_s1 + $0x94] sm:$0xf0]  ;;  %v1533_v11 = vld [vmem:[%s3035_s1 + $0x188] sm:$0xf]  ;;  %v1554_v12 = vor.u32 %v1994_v4, %v1551_v5  ;;  %v1958_v14 = vld [vmem:[%s3035_s1 + $0x8c] sm:$0xf] }
  0x21   :  { %459 = vmatpush.bf16.msra.mxu1 %v1462_v36  ;;  %473 = vmatpush.bf16.msra.mxu2 %v1338_v37  ;;  %v1992_v13 = vld [vmem:[%s3035_s1 + $0x194] sm:$0xf0]  ;;  %v1407_v15 = vld [vmem:[%s3035_s1 + $0x98] sm:$0xf0]  ;;  %v1990_v16 = vld [vmem:[%s3035_s1 + $0x18c] sm:$0xf]  ;;  %v1406_v18 = vor.u32 %v1960_v10, %v1405_v9 }
  0x22   :  { %487 = vmatpush.bf16.msra.mxu3 %v1466_v41  ;;  %v1535_v17 = vld [vmem:[%s3035_s1 + $0x198] sm:$0xf0]  ;;  %v1534_v19 = vor.u32 %v1992_v13, %v1533_v11  ;;  %v1410_v20 = vor.u32 %v1958_v14, %v1407_v15  ;;  %v1389_v21 = vld [vmem:[%s3035_s1 + $0x68] sm:$0xf]  ;;  %v1956_v22 = vld [vmem:[%s3035_s1 + $0x74] sm:$0xf0] }
  0x23   :  { %446 = vmatmul.bf16.vlgmr.msra.gmra.mxu0 %v2387_v51  ;;  %v1517_v23 = vld [vmem:[%s3035_s1 + $0x168] sm:$0xf]  ;;  %v1538_v24 = vor.u32 %v1990_v16, %v1535_v17  ;;  %v1988_v25 = vld [vmem:[%s3035_s1 + $0x174] sm:$0xf0]  ;;  %v1954_v26 = vld [vmem:[%s3035_s1 + $0x6c] sm:$0xf]  ;;  %v1390_v30 = vor.u32 %v1956_v22, %v1389_v21 }
  0x24   :  { %494 = vmatpush.bf16.msrb.mxu0 %v1454_v42  ;;  %474 = vmatmul.bf16.vlgmr.msra.gmra.mxu2 %v2387_v51  ;;  %v1391_v27 = vld [vmem:[%s3035_s1 + $0x78] sm:$0xf0]  ;;  %v1986_v28 = vld [vmem:[%s3035_s1 + $0x16c] sm:$0xf]  ;;  %v1518_v31 = vor.u32 %v1988_v25, %v1517_v23  ;;  %v1373_v33 = vld [vmem:[%s3035_s1 + $0x48] sm:$0xf] }
  0x25   :  { %508 = vmatpush.bf16.msrb.mxu1 %v1582_v45  ;;  %522 = vmatpush.bf16.msrb.mxu2 %v1458_v46  ;;  %v1519_v29 = vld [vmem:[%s3035_s1 + $0x178] sm:$0xf0]  ;;  %v1394_v32 = vor.u32 %v1954_v26, %v1391_v27  ;;  %v1952_v34 = vld [vmem:[%s3035_s1 + $0x54] sm:$0xf0]  ;;  %v1501_v35 = vld [vmem:[%s3035_s1 + $0x148] sm:$0xf] }
  0x26   :  { %536 = vmatpush.bf16.msrb.mxu3 %v1586_v50  ;;  %460 = vmatmul.bf16.vlgmr.msra.gmra.mxu1 %v2398_v55  ;;  %v1522_v36 = vor.u32 %v1986_v28, %v1519_v29  ;;  %v1984_v37 = vld [vmem:[%s3035_s1 + $0x154] sm:$0xf0]  ;;  %v1950_v38 = vld [vmem:[%s3035_s1 + $0x4c] sm:$0xf]  ;;  %v1375_v39 = vld [vmem:[%s3035_s1 + $0x58] sm:$0xf0]  ;;  %v1374_v42 = vor.u32 %v1952_v34, %v1373_v33 }
  0x27   :  { %488 = vmatmul.bf16.vlgmr.msra.gmra.mxu3 %v2398_v55  ;;  %v1982_v40 = vld [vmem:[%s3035_s1 + $0x14c] sm:$0xf]  ;;  %v1503_v41 = vld [vmem:[%s3035_s1 + $0x158] sm:$0xf0]  ;;  %v1502_v43 = vor.u32 %v1984_v37, %v1501_v35  ;;  %v1378_v44 = vor.u32 %v1950_v38, %v1375_v39  ;;  %v1357_v45 = vld [vmem:[%s3035_s1 + $0x28] sm:$0xf] }
  0x28   :  { %495 = vmatpush.bf16.msrb.mxu0 %v1438_v58  ;;  %v1948_v46 = vld [vmem:[%s3035_s1 + $0x34] sm:$0xf0]  ;;  %v1485_v47 = vld [vmem:[%s3035_s1 + $0x128] sm:$0xf]  ;;  %v1506_v48 = vor.u32 %v1982_v40, %v1503_v41  ;;  %v1946_v50 = vld [vmem:[%s3035_s1 + $0x2c] sm:$0xf] }
  0x29   :  { %509 = vmatpush.bf16.msrb.mxu1 %v1566_v59  ;;  %523 = vmatpush.bf16.msrb.mxu2 %v1442_v60  ;;  %v1980_v49 = vld [vmem:[%s3035_s1 + $0x134] sm:$0xf0]  ;;  %v1359_v52 = vld [vmem:[%s3035_s1 + $0x38] sm:$0xf0]  ;;  %v1978_v53 = vld [vmem:[%s3035_s1 + $0x12c] sm:$0xf]  ;;  %v1358_v56 = vor.u32 %v1948_v46, %v1357_v45 }
  0x2a   :  { %537 = vmatpush.bf16.msrb.mxu3 %v1570_v0  ;;  %v1487_v54 = vld [vmem:[%s3035_s1 + $0x138] sm:$0xf0]  ;;  %v1341_v57 = vld [vmem:[%s3035_s1 + $0x8] sm:$0xf]  ;;  %v1486_v58 = vor.u32 %v1980_v49, %v1485_v47  ;;  %v1362_v59 = vor.u32 %v1946_v50, %v1359_v52  ;;  %v1944_v60 = vld [vmem:[%s3035_s1 + $0x14] sm:$0xf0] }
  0x2b   :  { %v1469_v61 = vld [vmem:[%s3035_s1 + $0x108] sm:$0xf]  ;;  %v1976_v62 = vld [vmem:[%s3035_s1 + $0x114] sm:$0xf0]  ;;  %v1490_v63 = vor.u32 %v1978_v53, %v1487_v54  ;;  %v1942_v0 = vld [vmem:[%s3035_s1 + $0xc] sm:$0xf] }
  0x2c   :  { %496 = vmatpush.bf16.msrb.mxu0 %v1422_v6  ;;  %v1343_v1 = vld [vmem:[%s3035_s1 + $0x18] sm:$0xf0]  ;;  %v1974_v2 = vld [vmem:[%s3035_s1 + $0x10c] sm:$0xf]  ;;  %v1645_v4 = vld [vmem:[%s3037_s3 + $0x70] sm:$0xf]  ;;  %v1342_v6 = vor.u32 %v1944_v60, %v1341_v57  ;;  %v1470_v9 = vor.u32 %v1976_v62, %v1469_v61 }
  0x2d   :  { %510 = vmatpush.bf16.msrb.mxu1 %v1550_v7  ;;  %524 = vmatpush.bf16.msrb.mxu2 %v1426_v8  ;;  %v1471_v3 = vld [vmem:[%s3035_s1 + $0x118] sm:$0xf0]  ;;  %v2020_v5 = vld [vmem:[%s3037_s3 + $0x74] sm:$0xf0]  ;;  %v1709_v7 = vld [vmem:[%s3037_s3 + $0xf0] sm:$0xf]  ;;  %v1346_v10 = vor.u32 %v1942_v0, %v1343_v1 }
  0x2e   :  { %538 = vmatpush.bf16.msrb.mxu3 %v1554_v12  ;;  %v2036_v8 = vld [vmem:[%s3037_s3 + $0xf4] sm:$0xf0]  ;;  %v1474_v11 = vor.u32 %v1974_v2, %v1471_v3  ;;  %v1646_v12 = vor.u32 %v2020_v5, %v1645_v4  ;;  %v1637_v13 = vld [vmem:[%s3037_s3 + $0x60] sm:$0xf]  ;;  %v2018_v14 = vld [vmem:[%s3037_s3 + $0x64] sm:$0xf0] }
  0x2f   :  { %v1710_v15 = vor.u32 %v2036_v8, %v1709_v7  ;;  %v1701_v16 = vld [vmem:[%s3037_s3 + $0xe0] sm:$0xf]  ;;  %v2034_v17 = vld [vmem:[%s3037_s3 + $0xe4] sm:$0xf0]  ;;  %v1693_v22 = vld [vmem:[%s3037_s3 + $0xd0] sm:$0xf] }
  0x30   :  { %497 = vmatpush.bf16.msrb.mxu0 %v1406_v18  ;;  %v1638_v18 = vor.u32 %v2018_v14, %v1637_v13  ;;  %v1702_v21 = vor.u32 %v2034_v17, %v1701_v16  ;;  %v2032_v23 = vld [vmem:[%s3037_s3 + $0xd4] sm:$0xf0]  ;;  %v1621_v25 = vld [vmem:[%s3037_s3 + $0x40] sm:$0xf]  ;;  %v1613_v29 = vld [vmem:[%s3037_s3 + $0x30] sm:$0xf] }
  0x31   :  { %511 = vmatpush.bf16.msrb.mxu1 %v1534_v19  ;;  %525 = vmatpush.bf16.msrb.mxu2 %v1410_v20  ;;  %v1629_v19 = vld [vmem:[%s3037_s3 + $0x50] sm:$0xf]  ;;  %v2016_v20 = vld [vmem:[%s3037_s3 + $0x54] sm:$0xf0]  ;;  %v1694_v26 = vor.u32 %v2032_v23, %v1693_v22  ;;  %v1685_v27 = vld [vmem:[%s3037_s3 + $0xc0] sm:$0xf] }
  0x32   :  { %539 = vmatpush.bf16.msrb.mxu3 %v1538_v24  ;;  %v1630_v24 = vor.u32 %v2016_v20, %v1629_v19  ;;  %v2028_v33 = vld [vmem:[%s3037_s3 + $0xb4] sm:$0xf0]  ;;  %v1605_v35 = vld [vmem:[%s3037_s3 + $0x20] sm:$0xf]  ;;  %v2026_v39 = vld [vmem:[%s3037_s3 + $0xa4] sm:$0xf0] }
  0x33   :  { %v1669_v38 = vld [vmem:[%s3037_s3 + $0xa0] sm:$0xf]  ;;  %v1597_v41 = vld [vmem:[%s3037_s3 + $0x10] sm:$0xf]  ;;  %v2006_v46 = vld [vmem:[%s3037_s3 + $0x4] sm:$0xf0] }
  0x34   :  { %498 = vmatpush.bf16.msrb.mxu0 %v1390_v30  ;;  %v2012_v30 = vld [vmem:[%s3037_s3 + $0x34] sm:$0xf0]  ;;  %v1589_v45 = vld [vmem:[%s3037_s3] sm:$0xf]  ;;  %v2019_v50 = vld [vmem:[%s3037_s3 + $0x74] sm:$0xf] }
  0x35   :  { %512 = vmatpush.bf16.msrb.mxu1 %v1518_v31  ;;  %526 = vmatpush.bf16.msrb.mxu2 %v1394_v32  ;;  %v1677_v32 = vld [vmem:[%s3037_s3 + $0xb0] sm:$0xf]  ;;  %v1614_v34 = vor.u32 %v2012_v30, %v1613_v29  ;;  %v1590_v47 = vor.u32 %v2006_v46, %v1589_v45  ;;  %v2052_v49 = vld [vmem:[%s3037_s3 + $0x174] sm:$0xf0]  ;;  %v1647_v53 = vld [vmem:[%s3037_s3 + $0x78] sm:$0xf0] }
  0x36   :  { %540 = vmatpush.bf16.msrb.mxu3 %v1522_v36  ;;  %v2010_v36 = vld [vmem:[%s3037_s3 + $0x24] sm:$0xf0]  ;;  %v1678_v37 = vor.u32 %v2028_v33, %v1677_v32  ;;  %v1661_v54 = vld [vmem:[%s3037_s3 + $0x90] sm:$0xf]  ;;  %v1650_v57 = vor.u32 %v2019_v50, %v1647_v53  ;;  %v2017_v62 = vld [vmem:[%s3037_s3 + $0x64] sm:$0xf] }
  0x37   :  { %v1606_v40 = vor.u32 %v2010_v36, %v1605_v35  ;;  %v2050_v60 = vld [vmem:[%s3037_s3 + $0x164] sm:$0xf0]  ;;  %v1653_v0 = vld [vmem:[%s3037_s3 + $0x80] sm:$0xf]  ;;  %v1837_v3 = vld [vmem:[%s3037_s3 + $0x1f0] sm:$0xf] }
  0x38   :  { %499 = vmatpush.bf16.msrb.mxu0 %v1374_v42  ;;  %v2008_v42 = vld [vmem:[%s3037_s3 + $0x14] sm:$0xf0]  ;;  %v2022_v2 = vld [vmem:[%s3037_s3 + $0x84] sm:$0xf0]  ;;  %v2035_v7 = vld [vmem:[%s3037_s3 + $0xf4] sm:$0xf] }
  0x39   :  { %513 = vmatpush.bf16.msrb.mxu1 %v1502_v43  ;;  %527 = vmatpush.bf16.msrb.mxu2 %v1378_v44  ;;  %v1670_v43 = vor.u32 %v2026_v39, %v1669_v38  ;;  %v1598_v44 = vor.u32 %v2008_v42, %v1597_v41  ;;  %v2068_v4 = vld [vmem:[%s3037_s3 + $0x1f4] sm:$0xf0]  ;;  %v1654_v5 = vor.u32 %v2022_v2, %v1653_v0  ;;  %v1711_v8 = vld [vmem:[%s3037_s3 + $0xf8] sm:$0xf0]  ;;  %v1829_v16 = vld [vmem:[%s3037_s3 + $0x1e0] sm:$0xf] }
  0x3a   :  { %541 = vmatpush.bf16.msrb.mxu3 %v1506_v48  ;;  %v1773_v48 = vld [vmem:[%s3037_s3 + $0x170] sm:$0xf]  ;;  %v1631_v14 = vld [vmem:[%s3037_s3 + $0x58] sm:$0xf0]  ;;  %v2066_v17 = vld [vmem:[%s3037_s3 + $0x1e4] sm:$0xf0] }
  0x3b   :  { %v1774_v52 = vor.u32 %v2052_v49, %v1773_v48  ;;  %v1830_v19 = vor.u32 %v2066_v17, %v1829_v16  ;;  %v1703_v20 = vld [vmem:[%s3037_s3 + $0xe8] sm:$0xf0]  ;;  %v1749_v22 = vld [vmem:[%s3037_s3 + $0x140] sm:$0xf]  ;;  %v2046_v23 = vld [vmem:[%s3037_s3 + $0x144] sm:$0xf0] }
  0x3c   :  { %500 = vmatpush.bf16.msrb.mxu0 %v1358_v56  ;;  %v2024_v56 = vld [vmem:[%s3037_s3 + $0x94] sm:$0xf0]  ;;  %v1695_v30 = vld [vmem:[%s3037_s3 + $0xd8] sm:$0xf0]  ;;  %v1741_v32 = vld [vmem:[%s3037_s3 + $0x130] sm:$0xf] }
  0x3d   :  { %514 = vmatpush.bf16.msrb.mxu1 %v1486_v58  ;;  %528 = vmatpush.bf16.msrb.mxu2 %v1362_v59  ;;  %v1662_v58 = vor.u32 %v2024_v56, %v1661_v54  ;;  %v1765_v59 = vld [vmem:[%s3037_s3 + $0x160] sm:$0xf]  ;;  %v2044_v33 = vld [vmem:[%s3037_s3 + $0x134] sm:$0xf0]  ;;  %v1615_v36 = vld [vmem:[%s3037_s3 + $0x38] sm:$0xf0] }
  0x3e   :  { %542 = vmatpush.bf16.msrb.mxu3 %v1490_v63  ;;  %v1766_v61 = vor.u32 %v2050_v60, %v1765_v59  ;;  %v1639_v63 = vld [vmem:[%s3037_s3 + $0x68] sm:$0xf0]  ;;  %v1742_v35 = vor.u32 %v2044_v33, %v1741_v32  ;;  %v1813_v38 = vld [vmem:[%s3037_s3 + $0x1c0] sm:$0xf]  ;;  %v2062_v39 = vld [vmem:[%s3037_s3 + $0x1c4] sm:$0xf0] }
  0x3f   :  { %v1642_v1 = vor.u32 %v2017_v62, %v1639_v63  ;;  %v1814_v41 = vor.u32 %v2062_v39, %v1813_v38  ;;  %v1687_v42 = vld [vmem:[%s3037_s3 + $0xc8] sm:$0xf0]  ;;  %v2042_v45 = vld [vmem:[%s3037_s3 + $0x124] sm:$0xf0]  ;;  %v2009_v46 = vld [vmem:[%s3037_s3 + $0x24] sm:$0xf] }
  0x40   :  { %501 = vmatpush.bf16.msrb.mxu0 %v1342_v6  ;;  %v1838_v6 = vor.u32 %v2068_v4, %v1837_v3  ;;  %v1607_v48 = vld [vmem:[%s3037_s3 + $0x28] sm:$0xf0]  ;;  %v2777_v49 = vld [vmem:[%s3038_s2] sm:$0xf]  ;;  %v2060_v53 = vld [vmem:[%s3037_s3 + $0x1b4] sm:$0xf0] }
  0x41   :  { %515 = vmatpush.bf16.msrb.mxu1 %v1470_v9  ;;  %529 = vmatpush.bf16.msrb.mxu2 %v1346_v10  ;;  %v1714_v9 = vor.u32 %v2035_v7, %v1711_v8  ;;  %v1757_v10 = vld [vmem:[%s3037_s3 + $0x150] sm:$0xf]  ;;  %v1610_v50 = vor.u32 %v2009_v46, %v1607_v48  ;;  %v2027_v54 = vld [vmem:[%s3037_s3 + $0xb4] sm:$0xf]  ;;  %v2040_v59 = vld [vmem:[%s3037_s3 + $0x114] sm:$0xf0] }
  0x42   :  { %543 = vmatpush.bf16.msrb.mxu3 %v1474_v11  ;;  %v2048_v11 = vld [vmem:[%s3037_s3 + $0x154] sm:$0xf0]  ;;  %v2007_v62 = vld [vmem:[%s3037_s3 + $0x14] sm:$0xf]  ;;  %v1599_v63 = vld [vmem:[%s3037_s3 + $0x18] sm:$0xf0] }
  0x43   :  { %502 = vmatmul.bf16.vlgmr.msrb.gmra.mxu0 %v2387_v51  ;;  %v1758_v13 = vor.u32 %v2048_v11, %v1757_v10  ;;  %v1797_v0 = vld [vmem:[%s3037_s3 + $0x1a0] sm:$0xf]  ;;  %v2058_v2 = vld [vmem:[%s3037_s3 + $0x1a4] sm:$0xf0]  ;;  %v2025_v3 = vld [vmem:[%s3037_s3 + $0xa4] sm:$0xf] }
  0x44   :  { %952 = vmatpush.bf16.msra.mxu0 %v1646_v12  ;;  %516 = vmatmul.bf16.vlgmr.msrb.gmra.mxu1 %v2398_v55  ;;  %v2015_v12 = vld [vmem:[%s3037_s3 + $0x54] sm:$0xf]  ;;  %v1671_v4 = vld [vmem:[%s3037_s3 + $0xa8] sm:$0xf0]  ;;  %v100_v7 = vperm.slane %v2777_v49, 0 }
  0x45   :  { %966 = vmatpush.bf16.msra.mxu1 %v1710_v15  ;;  %530 = vmatmul.bf16.vlgmr.msrb.gmra.mxu2 %v2387_v51  ;;  %v2014_v51 = vld [vmem:[%s3037_s3 + $0x44] sm:$0xf0]  ;;  %v1634_v15 = vor.u32 %v2015_v12, %v1631_v14  ;;  %v1717_v8 = vld [vmem:[%s3037_s3 + $0x100] sm:$0xf]  ;;  %v2005_v10 = vld [vmem:[%s3037_s3 + $0x4] sm:$0xf] }
  0x46   :  { %544 = vmatmul.bf16.vlgmr.msrb.gmra.mxu3 %v2398_v55  ;;  %v2030_v55 = vld [vmem:[%s3037_s3 + $0xc4] sm:$0xf0]  ;;  %v1622_v28 = vor.u32 %v2014_v51, %v1621_v25  ;;  %980 = vmatpush.bf16.msra.mxu2 %v1774_v52  ;;  %v1750_v25 = vor.u32 %v2046_v23, %v1749_v22  ;;  %v1623_v51 = vld [vmem:[%s3037_s3 + $0x48] sm:$0xf0]  ;;  %v1805_v52 = vld [vmem:[%s3037_s3 + $0x1b0] sm:$0xf] }
  0x47   :  { %v1686_v31 = vor.u32 %v2030_v55, %v1685_v27  ;;  %994 = vmatpush.bf16.msra.mxu3 %v1838_v6  ;;  %v1821_v27 = vld [vmem:[%s3037_s3 + $0x1d0] sm:$0xf]  ;;  %v2064_v55 = vld [vmem:[%s3037_s3 + $0x1d4] sm:$0xf0]  ;;  %v1806_v56 = vor.u32 %v2060_v53, %v1805_v52  ;;  %v1674_v6 = vor.u32 %v2025_v3, %v1671_v4  ;;  %v1591_v12 = vld [vmem:[%s3037_s3 + $0x8] sm:$0xf0] }
  0x48   :  { %953 = vmatpush.bf16.msra.mxu0 %v1638_v18  ;;  %v2033_v18 = vld [vmem:[%s3037_s3 + $0xe4] sm:$0xf]  ;;  %v1822_v29 = vor.u32 %v2064_v55, %v1821_v27  ;;  %v1775_v14 = vld [vmem:[%s3037_s3 + $0x178] sm:$0xf0]  ;;  %v1789_v17 = vld [vmem:[%s3037_s3 + $0x190] sm:$0xf] }
  0x49   :  { %967 = vmatpush.bf16.msra.mxu1 %v1702_v21  ;;  %v1706_v21 = vor.u32 %v2033_v18, %v1703_v20  ;;  %v2056_v18 = vld [vmem:[%s3037_s3 + $0x194] sm:$0xf0]  ;;  %v1663_v22 = vld [vmem:[%s3037_s3 + $0x98] sm:$0xf0]  ;;  %v1781_v55 = vld [vmem:[%s3037_s3 + $0x180] sm:$0xf] }
  0x4a   :  { %981 = vmatpush.bf16.msra.mxu2 %v1766_v61  ;;  %v2067_v32 = vld [vmem:[%s3037_s3 + $0x1f4] sm:$0xf]  ;;  %v1839_v33 = vld [vmem:[%s3037_s3 + $0x1f8] sm:$0xf0]  ;;  %v2045_v52 = vld [vmem:[%s3037_s3 + $0x144] sm:$0xf] }
  0x4b   :  { %995 = vmatpush.bf16.msra.mxu3 %v1830_v19  ;;  %v2023_v19 = vld [vmem:[%s3037_s3 + $0x94] sm:$0xf]  ;;  %v1759_v38 = vld [vmem:[%s3037_s3 + $0x158] sm:$0xf0]  ;;  %v1751_v53 = vld [vmem:[%s3037_s3 + $0x148] sm:$0xf0] }
  0x4c   :  { %954 = vmatpush.bf16.msra.mxu0 %v1630_v24  ;;  %v2013_v24 = vld [vmem:[%s3037_s3 + $0x44] sm:$0xf] }
  0x4d   :  { %968 = vmatpush.bf16.msra.mxu1 %v1694_v26  ;;  %v1626_v26 = vor.u32 %v2013_v24, %v1623_v51  ;;  %v1666_v24 = vor.u32 %v2023_v19, %v1663_v22  ;;  %v1767_v51 = vld [vmem:[%s3037_s3 + $0x168] sm:$0xf0]  ;;  %v1727_v19 = vld [vmem:[%s3037_s3 + $0x118] sm:$0xf0] }
  0x4e   :  { %982 = vmatpush.bf16.msra.mxu2 %v1758_v13  ;;  %v2051_v13 = vld [vmem:[%s3037_s3 + $0x174] sm:$0xf] }
  0x4f   :  { %996 = vmatpush.bf16.msra.mxu3 %v1822_v29  ;;  %v1778_v16 = vor.u32 %v2051_v13, %v1775_v14  ;;  %v2021_v29 = vld [vmem:[%s3037_s3 + $0x84] sm:$0xf] }
  0x50   :  { %955 = vmatpush.bf16.msra.mxu0 %v1622_v28  ;;  %v2031_v28 = vld [vmem:[%s3037_s3 + $0xd4] sm:$0xf] }
  0x51   :  { %969 = vmatpush.bf16.msra.mxu1 %v1686_v31  ;;  %v1698_v31 = vor.u32 %v2031_v28, %v1695_v30  ;;  %v2054_v28 = vld [vmem:[%s3037_s3 + $0x184] sm:$0xf0] }
  0x52   :  { %983 = vmatpush.bf16.msra.mxu2 %v1750_v25  ;;  %v2049_v25 = vld [vmem:[%s3037_s3 + $0x164] sm:$0xf]  ;;  %v1782_v30 = vor.u32 %v2054_v28, %v1781_v55 }
  0x53   :  { %997 = vmatpush.bf16.msra.mxu3 %v1814_v41  ;;  %v1770_v27 = vor.u32 %v2049_v25, %v1767_v51  ;;  %v1719_v25 = vld [vmem:[%s3037_s3 + $0x108] sm:$0xf0] }
  0x54   :  { %956 = vmatpush.bf16.msra.mxu0 %v1614_v34  ;;  %v2011_v34 = vld [vmem:[%s3037_s3 + $0x34] sm:$0xf] }
  0x55   :  { %970 = vmatpush.bf16.msra.mxu1 %v1678_v37  ;;  %v1618_v37 = vor.u32 %v2011_v34, %v1615_v36  ;;  %v101_v36 = vperm.slane %v2777_v49, 1 }
  0x56   :  { %984 = vmatpush.bf16.msra.mxu2 %v1742_v35  ;;  %v1842_v35 = vor.u32 %v2067_v32, %v1839_v33  ;;  %v2053_v32 = vld [vmem:[%s3037_s3 + $0x184] sm:$0xf]  ;;  %v1783_v33 = vld [vmem:[%s3037_s3 + $0x188] sm:$0xf0] }
  0x57   :  { %998 = vmatpush.bf16.msra.mxu3 %v1806_v56 }
  0x58   :  { %957 = vmatpush.bf16.msra.mxu0 %v1606_v40  ;;  %v2029_v40 = vld [vmem:[%s3037_s3 + $0xc4] sm:$0xf] }
  0x59   :  { %971 = vmatpush.bf16.msra.mxu1 %v1670_v43  ;;  %v1690_v43 = vor.u32 %v2029_v40, %v1687_v42 }
  0x5c   :  { %958 = vmatpush.bf16.msra.mxu0 %v1598_v44  ;;  %v1733_v44 = vld [vmem:[%s3037_s3 + $0x120] sm:$0xf] }
  0x5d   :  { %972 = vmatpush.bf16.msra.mxu1 %v1662_v58  ;;  %v1725_v58 = vld [vmem:[%s3037_s3 + $0x110] sm:$0xf] }
  0x5e   :  { %v1726_v61 = vor.u32 %v2040_v59, %v1725_v58  ;;  %v2063_v58 = vld [vmem:[%s3037_s3 + $0x1d4] sm:$0xf]  ;;  %v1823_v59 = vld [vmem:[%s3037_s3 + $0x1d8] sm:$0xf0] }
  0x60   :  { %959 = vmatpush.bf16.msra.mxu0 %v1590_v47  ;;  %v1734_v47 = vor.u32 %v2042_v45, %v1733_v44  ;;  %v2065_v44 = vld [vmem:[%s3037_s3 + $0x1e4] sm:$0xf]  ;;  %v1831_v45 = vld [vmem:[%s3037_s3 + $0x1e8] sm:$0xf0] }
  0x61   :  { %973 = vmatpush.bf16.msra.mxu1 %v1654_v5  ;;  %v1798_v5 = vor.u32 %v2058_v2, %v1797_v0  ;;  %v1834_v48 = vor.u32 %v2065_v44, %v1831_v45  ;;  %v1743_v0 = vld [vmem:[%s3037_s3 + $0x138] sm:$0xf0] }
  0x62   :  { %985 = vmatpush.bf16.msra.mxu2 %v1734_v47 }
  0x63   :  { %999 = vmatpush.bf16.msra.mxu3 %v1798_v5 }
  0x64   :  { %1008 = vmatpush.bf16.msrb.mxu0 %v1650_v57  ;;  %v1679_v57 = vld [vmem:[%s3037_s3 + $0xb8] sm:$0xf0] }
  0x65   :  { %1022 = vmatpush.bf16.msrb.mxu1 %v1714_v9  ;;  %v1682_v60 = vor.u32 %v2027_v54, %v1679_v57  ;;  %v2038_v9 = vld [vmem:[%s3037_s3 + $0x104] sm:$0xf0]  ;;  %v1754_v57 = vor.u32 %v2045_v52, %v1751_v53 }
  0x66   :  { %986 = vmatpush.bf16.msra.mxu2 %v1726_v61  ;;  %v1718_v11 = vor.u32 %v2038_v9, %v1717_v8  ;;  %v1826_v61 = vor.u32 %v2063_v58, %v1823_v59  ;;  %v2076_v58 = vld [vmem:[%s3040_s5 + $0x38] sm:$0xff]  ;;  %v2075_v59 = vld [vmem:[%s3040_s5 + $0x30] sm:$0xff] }
  0x68   :  { %1009 = vmatpush.bf16.msrb.mxu0 %v1642_v1  ;;  %v1602_v1 = vor.u32 %v2007_v62, %v1599_v63  ;;  %v2043_v63 = vld [vmem:[%s3037_s3 + $0x134] sm:$0xf] }
  0x69   :  { %1023 = vmatpush.bf16.msrb.mxu1 %v1706_v21  ;;  %v1790_v21 = vor.u32 %v2056_v18, %v1789_v17  ;;  %v1746_v3 = vor.u32 %v2043_v63, %v1743_v0  ;;  %v2039_v18 = vld [vmem:[%s3037_s3 + $0x114] sm:$0xf]  ;;  %v2084_v63 = vld [vmem:[%s3040_s5 + $0x78] sm:$0xff] }
  0x6a   :  { %987 = vmatpush.bf16.msra.mxu2 %v1718_v11  ;;  %v2041_v11 = vld [vmem:[%s3037_s3 + $0x124] sm:$0xf]  ;;  %v1730_v22 = vor.u32 %v2039_v18, %v1727_v19  ;;  %v2071_v0 = vld [vmem:[%s3040_s5 + $0x10] sm:$0xff] }
  0x6b   :  { %1000 = vmatpush.bf16.msra.mxu3 %v1790_v21 }
  0x6c   :  { %1010 = vmatpush.bf16.msrb.mxu0 %v1634_v15  ;;  %v1594_v15 = vor.u32 %v2005_v10, %v1591_v12  ;;  %v1735_v12 = vld [vmem:[%s3037_s3 + $0x128] sm:$0xf0] }
  0x6d   :  { %1024 = vmatpush.bf16.msrb.mxu1 %v1698_v31  ;;  %v1655_v31 = vld [vmem:[%s3037_s3 + $0x88] sm:$0xf0]  ;;  %v1738_v13 = vor.u32 %v2041_v11, %v1735_v12  ;;  %v626_v11 = vld [vmem:[%s3041_s4] sm:$0x3] }
  0x6e   :  { %1036 = vmatpush.bf16.msrb.mxu2 %v1778_v16  ;;  %v1658_v34 = vor.u32 %v2021_v29, %v1655_v31  ;;  %v1807_v16 = vld [vmem:[%s3037_s3 + $0x1b8] sm:$0xf0] }
  0x6f   :  { %1001 = vmatpush.bf16.msra.mxu3 %v1782_v30  ;;  %v102_v30 = vperm.slane %v2777_v49, 2 }
  0x70   :  { %1011 = vmatpush.bf16.msrb.mxu0 %v1626_v26 }
  0x71   :  { %1025 = vmatpush.bf16.msrb.mxu1 %v1690_v43 }
  0x72   :  { %1037 = vmatpush.bf16.msrb.mxu2 %v1770_v27  ;;  %v1791_v27 = vld [vmem:[%s3037_s3 + $0x198] sm:$0xf0] }
  0x73   :  { %1050 = vmatpush.bf16.msrb.mxu3 %v1842_v35 }
  0x74   :  { %1012 = vmatpush.bf16.msrb.mxu0 %v1618_v37  ;;  %v2047_v37 = vld [vmem:[%s3037_s3 + $0x154] sm:$0xf] }
  0x75   :  { %1026 = vmatpush.bf16.msrb.mxu1 %v1682_v60  ;;  %v1762_v41 = vor.u32 %v2047_v37, %v1759_v38  ;;  %v103_v37 = vperm.slane %v2777_v49, 3 }
  0x77   :  { %1038 = vmatpush.bf16.msrb.mxu2 %v1762_v41  ;;  %1051 = vmatpush.bf16.msrb.mxu3 %v1834_v48 }
  0x78   :  { %1013 = vmatpush.bf16.msrb.mxu0 %v1610_v50 }
  0x79   :  { %1027 = vmatpush.bf16.msrb.mxu1 %v1674_v6  ;;  %v2061_v6 = vld [vmem:[%s3037_s3 + $0x1c4] sm:$0xf] }
  0x7b   :  { %1039 = vmatpush.bf16.msrb.mxu2 %v1754_v57  ;;  %1052 = vmatpush.bf16.msrb.mxu3 %v1826_v61  ;;  %v2073_v61 = vld [vmem:[%s3040_s5 + $0x20] sm:$0xff] }
  0x7c   :  { %1014 = vmatpush.bf16.msrb.mxu0 %v1602_v1 }
  0x7d   :  { %1028 = vmatpush.bf16.msrb.mxu1 %v1666_v24  ;;  %v2037_v24 = vld [vmem:[%s3037_s3 + $0x104] sm:$0xf] }
  0x7e   :  { %v1722_v55 = vor.u32 %v2037_v24, %v1719_v25 }
  0x7f   :  { %1040 = vmatpush.bf16.msrb.mxu2 %v1746_v3  ;;  %v2082_v3 = vld [vmem:[%s3040_s5 + $0x68] sm:$0xff] }
  0x80   :  { %1015 = vmatpush.bf16.msrb.mxu0 %v1594_v15  ;;  %v2059_v15 = vld [vmem:[%s3037_s3 + $0x1b4] sm:$0xf] }
  0x81   :  { %1029 = vmatpush.bf16.msrb.mxu1 %v1658_v34  ;;  %v1810_v17 = vor.u32 %v2059_v15, %v1807_v16  ;;  %v1786_v34 = vor.u32 %v2053_v32, %v1783_v33 }
  0x83   :  { %1041 = vmatpush.bf16.msrb.mxu2 %v1738_v13  ;;  %v628_v13 = vperm.slane %v626_v11, 0 }
  0x87   :  { %1042 = vmatpush.bf16.msrb.mxu2 %v1730_v22 }
  0x8b   :  { %1043 = vmatpush.bf16.msrb.mxu2 %v1722_v55 }
  0xa0   :  { %v447_v20 = vpop.f32.mrf.mxu0 }
  0xa1   :  { %v448_v26 = vadd.f32 %v447_v20, %v100_v7  ;;  %v2057_v20 = vld [vmem:[%s3037_s3 + $0x1a4] sm:$0xf] }
  0xa3   :  { %v461_v23 = vpop.f32.mrf.mxu1 }
  0xa4   :  { %v462_v39 = vadd.f32 %v461_v23, %v448_v26  ;;  %v1799_v23 = vld [vmem:[%s3037_s3 + $0x1a8] sm:$0xf0]  ;;  %v2055_v26 = vld [vmem:[%s3037_s3 + $0x194] sm:$0xf] }
  0xa5   :  { %v1802_v51 = vor.u32 %v2057_v20, %v1799_v23  ;;  %v1794_v28 = vor.u32 %v2055_v26, %v1791_v27 }
  0xa6   :  { %v550_v54 = vmax.f32 %v462_v39, 0.0 }
  0xa7   :  { %v475_v40 = vpop.f32.mrf.mxu2 }
  0xa8   :  { %v449_v42 = vpop.f32.mrf.mxu0  ;;  %v476_v50 = vadd.f32 %v475_v40, %v101_v36 }
  0xa9   :  { %v450_v46 = vadd.f32 %v449_v42, %v100_v7  ;;  %v1815_v7 = vld [vmem:[%s3037_s3 + $0x1c8] sm:$0xf0] }
  0xaa   :  { %v489_v43 = vpop.f32.mrf.mxu3  ;;  %v1818_v8 = vor.u32 %v2061_v6, %v1815_v7  ;;  %v2080_v6 = vld [vmem:[%s3040_s5 + $0x58] sm:$0xff] }
  0xab   :  { %v463_v47 = vpop.f32.mrf.mxu1  ;;  %v490_v62 = vadd.f32 %v489_v43, %v476_v50 }
  0xac   :  { %v464_v56 = vadd.f32 %v463_v47, %v450_v46  ;;  %1053 = vmatpush.bf16.msrb.mxu3 %v1818_v8  ;;  %v2079_v8 = vld [vmem:[%s3040_s5 + $0x50] sm:$0xff] }
  0xad   :  { %v551_v9 = vmax.f32 %v490_v62, 0.0  ;;  %v2072_v62 = vld [vmem:[%s3040_s5 + $0x18] sm:$0xff] }
  0xae   :  { %v554_v60 = vmax.f32 %v464_v56, 0.0 }
  0xaf   :  { %v477_v2 = vpop.f32.mrf.mxu2 }
  0xb0   :  { %v558_v1 = vpack.c.bf16 %v554_v60, %v550_v54  ;;  %v478_v4 = vadd.f32 %v477_v2, %v101_v36  ;;  %1054 = vmatpush.bf16.msrb.mxu3 %v1810_v17  ;;  %v2074_v60 = vld [vmem:[%s3040_s5 + $0x28] sm:$0xff] }
  0xb1   :  { %v2070_v2 = vld [vmem:[%s3040_s5 + $0x8] sm:$0xff] }
  0xb2   :  { %v491_v5 = vpop.f32.mrf.mxu3  ;;  %960 = vmatmul.bf16.vlgmr.msra.gmra.mxu0 %v558_v1 }
  0xb3   :  { %v492_v10 = vadd.f32 %v491_v5, %v478_v4  ;;  %1202 = vmatpush.bf16.msra.mxu0 %v2076_v58  ;;  %v2069_v4 = vld [vmem:[%s3040_s5] sm:$0xff] }
  0xb4   :  { %1055 = vmatpush.bf16.msrb.mxu3 %v1802_v51  ;;  %v2081_v5 = vld [vmem:[%s3040_s5 + $0x60] sm:$0xff] }
  0xb5   :  { %v555_v14 = vmax.f32 %v492_v10, 0.0  ;;  %v2078_v10 = vld [vmem:[%s3040_s5 + $0x48] sm:$0xff]  ;;  %v2085_v58 = vld [vmem:[%s3043_s7] sm:$0xff] }
  0xb7   :  { %v559_v21 = vpack.c.bf16 %v555_v14, %v551_v9  ;;  %1203 = vmatpush.bf16.msra.mxu0 %v2075_v59  ;;  %v2077_v14 = vld [vmem:[%s3040_s5 + $0x40] sm:$0xff] }
  0xb8   :  { %1056 = vmatpush.bf16.msrb.mxu3 %v1794_v28 }
  0xb9   :  { %974 = vmatmul.bf16.vlgmr.msra.gmra.mxu1 %v559_v21 }
  0xba   :  { %1216 = vmatpush.bf16.msra.mxu1 %v2084_v63 }
  0xbb   :  { %1204 = vmatpush.bf16.msra.mxu0 %v2074_v60 }
  0xbc   :  { %1057 = vmatpush.bf16.msrb.mxu3 %v1786_v34 }
  0xbf   :  { %1205 = vmatpush.bf16.msra.mxu0 %v2073_v61  ;;  %v2098_v61 = vld [vmem:[%s3039_s6] ss:$0 sm:$0xff] }
  0xc0   :  { %v503_v29 = vpop.f32.mrf.mxu0 }
  0xc1   :  { %v517_v31 = vpop.f32.mrf.mxu1  ;;  %v504_v35 = vadd.f32 %v503_v29, %v102_v30 }
  0xc2   :  { %1016 = vmatmul.bf16.vlgmr.msrb.gmra.mxu0 %v558_v1  ;;  %v2083_v1 = vld [vmem:[%s3040_s5 + $0x70] sm:$0xff] }
  0xc3   :  { %v518_v40 = vadd.f32 %v517_v31, %v504_v35  ;;  %1206 = vmatpush.bf16.msra.mxu0 %v2072_v62  ;;  %1217 = vmatpush.bf16.msra.mxu1 %v2083_v1  ;;  %v629_v31 = vperm.slane %v626_v11, 1 }
  0xc5   :  { %v552_v45 = vmax.f32 %v518_v40, 0.0 }
  0xc7   :  { %1207 = vmatpush.bf16.msra.mxu0 %v2071_v0  ;;  %1218 = vmatpush.bf16.msra.mxu1 %v2082_v3 }
  0xc8   :  { %v531_v36 = vpop.f32.mrf.mxu2  ;;  %v505_v39 = vpop.f32.mrf.mxu0 }
  0xc9   :  { %v545_v38 = vpop.f32.mrf.mxu3  ;;  %v506_v41 = vadd.f32 %v505_v39, %v102_v30  ;;  %v519_v42 = vpop.f32.mrf.mxu1  ;;  %1030 = vmatmul.bf16.vlgmr.msrb.gmra.mxu1 %v559_v21  ;;  %v532_v44 = vadd.f32 %v531_v36, %v103_v37 }
  0xcb   :  { %v520_v43 = vadd.f32 %v519_v42, %v506_v41  ;;  %v546_v50 = vadd.f32 %v545_v38, %v532_v44  ;;  %1208 = vmatpush.bf16.msra.mxu0 %v2070_v2  ;;  %1219 = vmatpush.bf16.msra.mxu1 %v2081_v5 }
  0xcd   :  { %v556_v46 = vmax.f32 %v520_v43, 0.0  ;;  %v553_v56 = vmax.f32 %v546_v50, 0.0  ;;  %v2092_v50 = vld [vmem:[%s3043_s7 + $0x38] sm:$0xff] }
  0xcf   :  { %v560_v47 = vpack.c.bf16 %v556_v46, %v552_v45  ;;  %1209 = vmatpush.bf16.msra.mxu0 %v2069_v4  ;;  %1220 = vmatpush.bf16.msra.mxu1 %v2080_v6 }
  0xd0   :  { %v533_v48 = vpop.f32.mrf.mxu2 }
  0xd1   :  { %v534_v52 = vadd.f32 %v533_v48, %v103_v37  ;;  %v547_v53 = vpop.f32.mrf.mxu3  ;;  %988 = vmatmul.bf16.vlgmr.msra.gmra.mxu2 %v560_v47 }
  0xd2   :  { %1301 = vmatpush.bf16.msra.mxu2 %v2092_v50 }
  0xd3   :  { %v548_v54 = vadd.f32 %v547_v53, %v534_v52  ;;  %1221 = vmatpush.bf16.msra.mxu1 %v2079_v8  ;;  %v2091_v52 = vld [vmem:[%s3043_s7 + $0x30] sm:$0xff]  ;;  %v2090_v53 = vld [vmem:[%s3043_s7 + $0x28] sm:$0xff]  ;;  %v2099_v8 = vld [vmem:[%s3042_s8] ss:$0 sm:$0xff] }
  0xd5   :  { %v557_v57 = vmax.f32 %v548_v54, 0.0  ;;  %v2089_v54 = vld [vmem:[%s3043_s7 + $0x20] sm:$0xff] }
  0xd6   :  { %1302 = vmatpush.bf16.msra.mxu2 %v2091_v52 }
  0xd7   :  { %v561_v49 = vpack.c.bf16 %v557_v57, %v553_v56  ;;  %1222 = vmatpush.bf16.msra.mxu1 %v2078_v10  ;;  %v2088_v56 = vld [vmem:[%s3043_s7 + $0x18] sm:$0xff]  ;;  %v2087_v57 = vld [vmem:[%s3043_s7 + $0x10] sm:$0xff] }
  0xd9   :  { %1002 = vmatmul.bf16.vlgmr.msra.gmra.mxu3 %v561_v49 }
  0xda   :  { %1303 = vmatpush.bf16.msra.mxu2 %v2090_v53 }
  0xdb   :  { %1223 = vmatpush.bf16.msra.mxu1 %v2077_v14 }
  0xde   :  { %1304 = vmatpush.bf16.msra.mxu2 %v2089_v54 }
  0xe1   :  { %1044 = vmatmul.bf16.vlgmr.msrb.gmra.mxu2 %v560_v47 }
  0xe2   :  { %1305 = vmatpush.bf16.msra.mxu2 %v2088_v56 }
  0xe6   :  { %1306 = vmatpush.bf16.msra.mxu2 %v2087_v57 }
  0xe9   :  { %1058 = vmatmul.bf16.vlgmr.msrb.gmra.mxu3 %v561_v49  ;;  %v2086_v49 = vld [vmem:[%s3043_s7 + $0x8] sm:$0xff] }
  0xea   :  { %1307 = vmatpush.bf16.msra.mxu2 %v2086_v49 }
  0xee   :  { %1308 = vmatpush.bf16.msra.mxu2 %v2085_v58 }
 0x12f   :  { %v961_v7 = vpop.f32.mrf.mxu0 }
 0x130   :  { %v962_v17 = vadd.f32 %v961_v7, %v628_v13 }
 0x136   :  { %v975_v9 = vpop.f32.mrf.mxu1 }
 0x137   :  { %v963_v15 = vpop.f32.mrf.mxu0  ;;  %v976_v20 = vadd.f32 %v975_v9, %v962_v17 }
 0x138   :  { %v964_v21 = vadd.f32 %v963_v15, %v628_v13 }
 0x13e   :  { %v977_v16 = vpop.f32.mrf.mxu1 }
 0x13f   :  { %v978_v22 = vadd.f32 %v977_v16, %v964_v21  ;;  %v1017_v24 = vpop.f32.mrf.mxu0 }
 0x140   :  { %v1018_v35 = vadd.f32 %v1017_v24, %v629_v31 }
 0x146   :  { %v1031_v26 = vpop.f32.mrf.mxu1 }
 0x147   :  { %v1019_v33 = vpop.f32.mrf.mxu0  ;;  %v1032_v37 = vadd.f32 %v1031_v26, %v1018_v35 }
 0x148   :  { %v1020_v38 = vadd.f32 %v1019_v33, %v629_v31 }
 0x14e   :  { %v1033_v36 = vpop.f32.mrf.mxu1 }
 0x14f   :  { %v1034_v40 = vadd.f32 %v1033_v36, %v1020_v38 }
 0x154   :  { %v989_v12 = vpop.f32.mrf.mxu2 }
 0x155   :  { %v990_v23 = vadd.f32 %v989_v12, %v976_v20 }
 0x15c   :  { %v1003_v18 = vpop.f32.mrf.mxu3  ;;  %v991_v19 = vpop.f32.mrf.mxu2 }
 0x15d   :  { %v1004_v25 = vadd.f32 %v1003_v18, %v990_v23  ;;  %v992_v51 = vadd.f32 %v991_v19, %v978_v22 }
 0x15f   :  { %v1064_v29 = vmax.f32 %v1004_v25, 0.0 }
 0x164   :  { %v1005_v27 = vpop.f32.mrf.mxu3  ;;  %v1045_v28 = vpop.f32.mrf.mxu2 }
 0x165   :  { %v1006_v55 = vadd.f32 %v1005_v27, %v992_v51  ;;  %v1046_v41 = vadd.f32 %v1045_v28, %v1032_v37 }
 0x167   :  { %v1066_v30 = vmax.f32 %v1006_v55, 0.0 }
 0x169   :  { %v1068_v32 = vpack.c.bf16 %v1066_v30, %v1064_v29 }
 0x16b   :  { %1210 = vmatmul.bf16.vlgmr.msra.gmra.mxu0 %v1068_v32 }
 0x16c   :  { %v1059_v34 = vpop.f32.mrf.mxu3  ;;  %v1047_v39 = vpop.f32.mrf.mxu2 }
 0x16d   :  { %v1060_v42 = vadd.f32 %v1059_v34, %v1046_v41  ;;  %v1048_v43 = vadd.f32 %v1047_v39, %v1034_v40 }
 0x16f   :  { %v1065_v46 = vmax.f32 %v1060_v42, 0.0 }
 0x174   :  { %v1061_v44 = vpop.f32.mrf.mxu3 }
 0x175   :  { %v1062_v45 = vadd.f32 %v1061_v44, %v1048_v43 }
 0x177   :  { %v1067_v47 = vmax.f32 %v1062_v45, 0.0 }
 0x179   :  { %v1069_v48 = vpack.c.bf16 %v1067_v47, %v1065_v46 }
 0x17b   :  { %1224 = vmatmul.bf16.vlgmr.msra.gmra.mxu1 %v1069_v48 }
 0x1e8   :  { %v1211_v59 = vpop.f32.mrf.mxu0 }
 0x1e9   :  { %v1212_v63 = vadd.f32 %v2098_v61, %v1211_v59 }
 0x1f0   :  { %v1213_v62 = vpop.f32.mrf.mxu0 }
 0x1f1   :  { %v1214_v0 = vadd.f32 %v2098_v61, %v1213_v62 }
 0x1f8   :  { %v1225_v60 = vpop.f32.mrf.mxu1 }
 0x1f9   :  { %v1226_v1 = vadd.f32 %v1225_v60, %v1212_v63 }
 0x1fb   :  { %v1230_v4 = vmax.f32 %v1226_v1, 0.0 }
 0x200   :  { %v1227_v2 = vpop.f32.mrf.mxu1 }
 0x201   :  { %v1228_v3 = vadd.f32 %v1227_v2, %v1214_v0 }
 0x203   :  { %v1231_v5 = vmax.f32 %v1228_v3, 0.0 }
 0x205   :  { %v1232_v6 = vpack.c.bf16 %v1231_v5, %v1230_v4 }
 0x207   :  { %1309 = vmatmul.bf16.vlgmr.msra.gmra.mxu2 %v1232_v6 }
 0x28a   :  { %v1310_v7 = vpop.f32.mrf.mxu2 }
 0x28b   :  { %v1311_v10 = vadd.f32 %v2099_v8, %v1310_v7 }
 0x292   :  { %v1312_v9 = vpop.f32.mrf.mxu2 }
 0x293   :  { %v1313_v11 = vadd.f32 %v2099_v8, %v1312_v9 }
 0x295   :  { %v2096_v12 = vpack.c.bf16 %v1313_v11, %v1311_v10 }
 0x297   :  { %2097 = vst [vmem:[%s3044_s9] sm:$0xff] %v2096_v12  }

</bundles_post_ra>
